<compile_context>
chip_gen: v6e
topology: v6e:2x2x1
jax: 0.10.0
libtpu: 0.0.40
codegen_flags: <defaults>
</compile_context>

<pallas_src>
import functools
import math

import jax
import jax.numpy as jnp
from jax.experimental import pallas as pl
from jax.experimental.pallas import tpu as pltpu


_VMEM_LIMIT = 32 * 1024 * 1024  # fits the 32 MiB scoped default on v6e/v7x


# ----------------------------------------------------------------------------
# Small helpers
# ----------------------------------------------------------------------------
def _round_up(x, m):
    return (x + m - 1) // m * m


def _tile_rows(m, cap=512):
    """Pick a row tile TM (multiple of 8) and padded row count Mp with TM | Mp."""
    m8 = _round_up(m, 8)
    if m8 <= cap:
        return m8, m8
    return cap, _round_up(m8, cap)


def _pad_rows(x2, mp):
    m = x2.shape[0]
    if mp == m:
        return x2
    return jnp.pad(x2, ((0, mp - m), (0, 0)))


def _layernorm(y, g, b, eps=1e-5):
    mu = jnp.mean(y, axis=-1, keepdims=True)
    var = jnp.mean(jnp.square(y - mu), axis=-1, keepdims=True)
    return (y - mu) * jax.lax.rsqrt(var + eps) * g + b


def _bf16(w):
    """Pre-cast a weight matrix to bf16 (no-op if already bf16)."""
    return w if w.dtype == jnp.bfloat16 else w.astype(jnp.bfloat16)


# ----------------------------------------------------------------------------
# Pallas kernels
# ----------------------------------------------------------------------------
def _linear_kernel(x_ref, w_ref, b_ref, o_ref, *, activation):
    x = x_ref[...].astype(jnp.bfloat16)
    y = jnp.dot(x, w_ref[...], preferred_element_type=jnp.float32) + b_ref[...]
    if activation == "relu":
        y = jnp.maximum(y, 0.0)
    o_ref[...] = y.astype(o_ref.dtype)


def pallas_linear(x, w, b, activation=None):
    """y = act(x @ w + b), row-tiled with a 'parallel' grid axis (bf16 weights)."""
    lead = x.shape[:-1]
    K = x.shape[-1]
    N = w.shape[1]
    M = int(math.prod(lead)) if lead else 1
    tm, mp = _tile_rows(M)
    x2 = _pad_rows(x.reshape(M, K), mp)
    out = pl.pallas_call(
        functools.partial(_linear_kernel, activation=activation),
        grid=(mp // tm,),
        in_specs=[
            pl.BlockSpec((tm, K), lambda i: (i, 0)),
            pl.BlockSpec((K, N), lambda i: (0, 0)),
            pl.BlockSpec((1, N), lambda i: (0, 0)),
        ],
        out_specs=pl.BlockSpec((tm, N), lambda i: (i, 0)),
        out_shape=jax.ShapeDtypeStruct((mp, N), x.dtype),
        compiler_params=pltpu.CompilerParams(
            dimension_semantics=("parallel",), vmem_limit_bytes=_VMEM_LIMIT),
    )(x2, _bf16(w), b.reshape(1, N).astype(jnp.float32))
    return out[:M].reshape(*lead, N)


def _mlp_kernel(*refs, n_layers):
    x_ref = refs[0]
    o_ref = refs[-1]
    y = x_ref[...].astype(jnp.float32)
    for i in range(n_layers):
        w = refs[1 + 2 * i][...]
        b = refs[2 + 2 * i][...]
        y = jnp.dot(y.astype(jnp.bfloat16), w, preferred_element_type=jnp.float32) + b
        if i < n_layers - 1:
            y = jnp.maximum(y, 0.0)
    o_ref[...] = y.astype(o_ref.dtype)


def pallas_mlp(x, layers):
    """Fused MLP (ReLU between layers, none on the last) in ONE kernel."""
    lead = x.shape[:-1]
    K = x.shape[-1]
    N = layers[-1][0].shape[1]
    M = int(math.prod(lead)) if lead else 1
    tm, mp = _tile_rows(M)
    x2 = _pad_rows(x.reshape(M, K), mp)
    in_specs = [pl.BlockSpec((tm, K), lambda i: (i, 0))]
    operands = [x2]
    for w, b in layers:
        kin, nout = w.shape
        in_specs.append(pl.BlockSpec((kin, nout), lambda i: (0, 0)))
        in_specs.append(pl.BlockSpec((1, nout), lambda i: (0, 0)))
        operands.append(_bf16(w))
        operands.append(b.reshape(1, nout).astype(jnp.float32))
    out = pl.pallas_call(
        functools.partial(_mlp_kernel, n_layers=len(layers)),
        grid=(mp // tm,),
        in_specs=in_specs,
        out_specs=pl.BlockSpec((tm, N), lambda i: (i, 0)),
        out_shape=jax.ShapeDtypeStruct((mp, N), x.dtype),
        compiler_params=pltpu.CompilerParams(
            dimension_semantics=("parallel",), vmem_limit_bytes=_VMEM_LIMIT),
    )(*operands)
    return out[:M].reshape(*lead, N)


def _bbox_head_kernel(*refs, with_score):
    if with_score:
        x_ref, ref_ref, w0, b0, w1, b1, w2, b2, ws, bs, o_ref = refs
    else:
        x_ref, ref_ref, w0, b0, w1, b1, w2, b2, o_ref = refs
    x = x_ref[...].astype(jnp.bfloat16)
    h = jnp.maximum(jnp.dot(x, w0[...], preferred_element_type=jnp.float32) + b0[...], 0.0)
    h = jnp.maximum(jnp.dot(h.astype(jnp.bfloat16), w1[...],
                            preferred_element_type=jnp.float32) + b1[...], 0.0)
    delta = jnp.dot(h.astype(jnp.bfloat16), w2[...],
                    preferred_element_type=jnp.float32) + b2[...]
    # sigmoid(delta + inverse_sigmoid(ref)) with torch eps semantics (eps=1e-5)
    r = jnp.clip(ref_ref[...].astype(jnp.float32), 0.0, 1.0)
    eps = 1e-5
    inv = jnp.log(jnp.maximum(r, eps) / jnp.maximum(1.0 - r, eps))
    bbox = 1.0 / (1.0 + jnp.exp(-(delta + inv)))
    if with_score:
        logits = jnp.dot(x, ws[...], preferred_element_type=jnp.float32) + bs[...]
        o_ref[...] = jnp.concatenate([bbox, logits], axis=-1).astype(o_ref.dtype)
    else:
        o_ref[...] = bbox.astype(o_ref.dtype)


def _bbox_head_call(x, ref, layers, score=None):
    """3-layer bbox MLP + inverse-sigmoid refinement + sigmoid (+ fused score head)."""
    B, L, D = x.shape
    (w0, b0), (w1, b1), (w2, b2) = layers
    C = w2.shape[1]
    d1, d2 = w0.shape[1], w1.shape[1]
    M = B * L
    tm, mp = _tile_rows(M)
    x2 = _pad_rows(x.reshape(M, D), mp)
    r2 = _pad_rows(ref.reshape(M, C), mp)
    operands = [x2, r2, _bf16(w0), b0.reshape(1, d1), _bf16(w1), b1.reshape(1, d2),
                _bf16(w2), b2.reshape(1, C)]
    in_specs = [
        pl.BlockSpec((tm, D), lambda i: (i, 0)),
        pl.BlockSpec((tm, C), lambda i: (i, 0)),
        pl.BlockSpec((D, d1), lambda i: (0, 0)),
        pl.BlockSpec((1, d1), lambda i: (0, 0)),
        pl.BlockSpec((d1, d2), lambda i: (0, 0)),
        pl.BlockSpec((1, d2), lambda i: (0, 0)),
        pl.BlockSpec((d2, C), lambda i: (0, 0)),
        pl.BlockSpec((1, C), lambda i: (0, 0)),
    ]
    with_score = score is not None
    n_out = C
    if with_score:
        ws, bs = score
        nc = ws.shape[1]
        n_out = C + nc
        operands += [_bf16(ws), bs.reshape(1, nc)]
        in_specs += [pl.BlockSpec((D, nc), lambda i: (0, 0)),
                     pl.BlockSpec((1, nc), lambda i: (0, 0))]
    out = pl.pallas_call(
        functools.partial(_bbox_head_kernel, with_score=with_score),
        grid=(mp // tm,),
        in_specs=in_specs,
        out_specs=pl.BlockSpec((tm, n_out), lambda i: (i, 0)),
        out_shape=jax.ShapeDtypeStruct((mp, n_out), x.dtype),
        compiler_params=pltpu.CompilerParams(
            dimension_semantics=("parallel",), vmem_limit_bytes=_VMEM_LIMIT),
    )(*operands)
    out = out[:M]
    if with_score:
        return out[:, :C].reshape(B, L, C), out[:, C:].reshape(B, L, nc)
    return out.reshape(B, L, C)


def pallas_bbox_head(x, ref, layers):
    return _bbox_head_call(x, ref, layers, score=None)


def pallas_bbox_score_head(x, ref, layers, score):
    return _bbox_head_call(x, ref, layers, score=score)


def _self_attn_kernel(tgt_ref, qpos_ref, qw_ref, qb_ref, kw_ref, kb_ref, vw_ref, vb_ref,
                      ow_ref, ob_ref, g_ref, gb_ref, o_ref, *, num_heads, scale):
    x = tgt_ref[0].astype(jnp.float32)                     # (L, D)
    xq = (x + qpos_ref[0].astype(jnp.float32)).astype(jnp.bfloat16)
    x_b = x.astype(jnp.bfloat16)
    q = jnp.dot(xq, qw_ref[...], preferred_element_type=jnp.float32) + qb_ref[...]
    k = jnp.dot(xq, kw_ref[...], preferred_element_type=jnp.float32) + kb_ref[...]
    v = jnp.dot(x_b, vw_ref[...], preferred_element_type=jnp.float32) + vb_ref[...]
    L, D = x.shape
    Dh = D // num_heads
    heads = []
    for h in range(num_heads):
        sl = slice(h * Dh, (h + 1) * Dh)
        qh = q[:, sl].astype(jnp.bfloat16)
        kh = k[:, sl].astype(jnp.bfloat16)
        vh = v[:, sl].astype(jnp.bfloat16)
        # s = qh @ kh^T (contraction on the feature dim, no explicit transpose)
        s = jax.lax.dot_general(qh, kh, (((1,), (1,)), ((), ())),
                                preferred_element_type=jnp.float32) * scale
        s = s - jnp.max(s, axis=-1, keepdims=True)
        p = jnp.exp(s)
        p = p * pl.reciprocal(jnp.sum(p, axis=-1, keepdims=True), approx=True)
        heads.append(jnp.dot(p.astype(jnp.bfloat16), vh, preferred_element_type=jnp.float32))
    # single full-width output projection (K = D feeds the full MXU)
    ctx = jnp.concatenate(heads, axis=-1).astype(jnp.bfloat16)      # (L, D)
    y = x + jnp.dot(ctx, ow_ref[...], preferred_element_type=jnp.float32) + ob_ref[...]
    o_ref[0] = _layernorm(y, g_ref[...], gb_ref[...]).astype(o_ref.dtype)


def pallas_self_attention_block(tgt, query_pos, p, num_heads):
    """QKV proj + MHA + out-proj + residual + LayerNorm1 fused; grid over batch."""
    B, L, D = tgt.shape
    Dh = D // num_heads
    scale = 1.0 / math.sqrt(Dh)
    seq = pl.BlockSpec((1, L, D), lambda b: (b, 0, 0))
    mat = pl.BlockSpec((D, D), lambda b: (0, 0))
    vec = pl.BlockSpec((1, D), lambda b: (0, 0))
    return pl.pallas_call(
        functools.partial(_self_attn_kernel, num_heads=num_heads, scale=scale),
        grid=(B,),
        in_specs=[seq, seq, mat, vec, mat, vec, mat, vec, mat, vec, vec, vec],
        out_specs=seq,
        out_shape=jax.ShapeDtypeStruct((B, L, D), tgt.dtype),
        compiler_params=pltpu.CompilerParams(
            dimension_semantics=("parallel",), vmem_limit_bytes=_VMEM_LIMIT),
    )(tgt, query_pos,
      _bf16(p["q_w"]), p["q_b"].reshape(1, D),
      _bf16(p["k_w"]), p["k_b"].reshape(1, D),
      _bf16(p["v_w"]), p["v_b"].reshape(1, D),
      _bf16(p["attn_out_w"]), p["attn_out_b"].reshape(1, D),
      p["norm1_g"].reshape(1, D), p["norm1_b"].reshape(1, D))


def _ffn_kernel(x_ref, w1_ref, b1_ref, w2_ref, b2_ref, g_ref, gb_ref, o_ref):
    x = x_ref[...].astype(jnp.float32)
    h = jnp.dot(x.astype(jnp.bfloat16), w1_ref[...],
                preferred_element_type=jnp.float32) + b1_ref[...]
    h = jnp.maximum(h, 0.0)
    y = jnp.dot(h.astype(jnp.bfloat16), w2_ref[...],
                preferred_element_type=jnp.float32) + b2_ref[...]
    y = x + y
    o_ref[...] = _layernorm(y, g_ref[...], gb_ref[...]).astype(o_ref.dtype)


def pallas_ffn_block(x, w1, b1, w2, b2, g, gb):
    """linear -> ReLU -> linear -> residual -> LayerNorm3 fused, row-tiled."""
    B, L, D = x.shape
    FF = w1.shape[1]
    M = B * L
    tm, mp = _tile_rows(M)
    x2 = _pad_rows(x.reshape(M, D), mp)
    out = pl.pallas_call(
        _ffn_kernel,
        grid=(mp // tm,),
        in_specs=[
            pl.BlockSpec((tm, D), lambda i: (i, 0)),
            pl.BlockSpec((D, FF), lambda i: (0, 0)),
            pl.BlockSpec((1, FF), lambda i: (0, 0)),
            pl.BlockSpec((FF, D), lambda i: (0, 0)),
            pl.BlockSpec((1, D), lambda i: (0, 0)),
            pl.BlockSpec((1, D), lambda i: (0, 0)),
            pl.BlockSpec((1, D), lambda i: (0, 0)),
        ],
        out_specs=pl.BlockSpec((tm, D), lambda i: (i, 0)),
        out_shape=jax.ShapeDtypeStruct((mp, D), x.dtype),
        compiler_params=pltpu.CompilerParams(
            dimension_semantics=("parallel",), vmem_limit_bytes=_VMEM_LIMIT),
    )(x2, _bf16(w1), b1.reshape(1, FF), _bf16(w2), b2.reshape(1, D),
      g.reshape(1, D), gb.reshape(1, D))
    return out[:M].reshape(B, L, D)


def _deform_epilogue_kernel(samp_ref, attn_ref, tgt_ref, w_ref, b_ref, g_ref, gb_ref,
                            o_ref, *, num_heads, num_lp):
    x = tgt_ref[0].astype(jnp.float32)                     # (Lq, D)
    Lq, D = x.shape
    heads = []
    for h in range(num_heads):
        samp = samp_ref[0, h]                              # (Lq, LP, Dh)
        aw = attn_ref[0, h]                                # (Lq, LP)   no trailing-1 dim
        # vectorized weighted sum over the (level, point) axis
        heads.append(jnp.sum(samp * aw[:, :, None], axis=1))   # (Lq, Dh)
    # single full-width output projection (K = D feeds the full MXU)
    ctx = jnp.concatenate(heads, axis=-1).astype(jnp.bfloat16)  # (Lq, D)
    y = x + jnp.dot(ctx, w_ref[...], preferred_element_type=jnp.float32) + b_ref[...]
    o_ref[0] = _layernorm(y, g_ref[...], gb_ref[...]).astype(o_ref.dtype)


def pallas_deform_epilogue(sampled, attn, tgt, ow, ob, g, gb, num_heads):
    """Weighted sum over (level,point) + output_proj + residual + norm2 fused.

    sampled: (B, H, Lq, LP, Dh) -- pure view of the channel-last gather output.
    attn:    (B, H, Lq, LP)
    """
    B, H, Lq, LP, Dh = sampled.shape
    D = tgt.shape[-1]
    return pl.pallas_call(
        functools.partial(_deform_epilogue_kernel, num_heads=num_heads, num_lp=LP),
        grid=(B,),
        in_specs=[
            pl.BlockSpec((1, H, Lq, LP, Dh), lambda b: (b, 0, 0, 0, 0)),
            pl.BlockSpec((1, H, Lq, LP), lambda b: (b, 0, 0, 0)),
            pl.BlockSpec((1, Lq, D), lambda b: (b, 0, 0)),
            pl.BlockSpec((D, D), lambda b: (0, 0)),
            pl.BlockSpec((1, D), lambda b: (0, 0)),
            pl.BlockSpec((1, D), lambda b: (0, 0)),
            pl.BlockSpec((1, D), lambda b: (0, 0)),
        ],
        out_specs=pl.BlockSpec((1, Lq, D), lambda b: (b, 0, 0)),
        out_shape=jax.ShapeDtypeStruct((B, Lq, D), tgt.dtype),
        compiler_params=pltpu.CompilerParams(
            dimension_semantics=("parallel",), vmem_limit_bytes=_VMEM_LIMIT),
    )(sampled, attn, tgt, _bf16(ow), ob.reshape(1, D), g.reshape(1, D), gb.reshape(1, D))


# ----------------------------------------------------------------------------
# Plain-JAX glue (reshapes + the data-dependent gather)
# ----------------------------------------------------------------------------
def grid_sample_bilinear_nhwc(img, grid):
    """torch.F.grid_sample(bilinear, zeros, align_corners=False), channel-last.

    img: (N, H, W, C); grid: (N, Hg, Wg, 2) in [-1,1]; returns (N, Hg, Wg, C).
    """
    # TODO(synk): data-dependent bilinear gather has no clean BlockSpec mapping;
    # kept in plain JAX (would need a manual DMA-gather Pallas kernel).
    N, H, W, C = img.shape
    x = (grid[..., 0] + 1.0) * W * 0.5 - 0.5
    y = (grid[..., 1] + 1.0) * H * 0.5 - 0.5
    x0 = jnp.floor(x)
    y0 = jnp.floor(y)
    x1 = x0 + 1.0
    y1 = y0 + 1.0
    wx1 = x - x0
    wx0 = 1.0 - wx1
    wy1 = y - y0
    wy0 = 1.0 - wy1
    flat = img.reshape(N, H * W, C)

    def gather(ix, iy):
        valid = (ix >= 0) & (ix <= W - 1) & (iy >= 0) & (iy <= H - 1)
        ixc = jnp.clip(ix, 0, W - 1).astype(jnp.int32)
        iyc = jnp.clip(iy, 0, H - 1).astype(jnp.int32)
        idx = (iyc * W + ixc).reshape(N, -1)                        # (N, Hg*Wg)
        idxb = jnp.broadcast_to(idx[:, :, None], (N, idx.shape[1], C))
        vals = jnp.take_along_axis(flat, idxb, axis=1)              # (N, Hg*Wg, C)
        vals = vals.reshape(N, *ix.shape[1:], C)
        return vals * valid[..., None].astype(img.dtype)

    out = (
        gather(x0, y0) * (wy0 * wx0)[..., None]
        + gather(x1, y0) * (wy0 * wx1)[..., None]
        + gather(x0, y1) * (wy1 * wx0)[..., None]
        + gather(x1, y1) * (wy1 * wx1)[..., None]
    )
    return out  # (N, Hg, Wg, C)


def ms_deformable_attention(p, tgt, query, reference_points, v, spatial_shapes,
                            num_heads, num_levels, num_points, norm_g, norm_b):
    """v: pre-projected value (B, Lv, H, Dh) -- value_proj is hoisted out of the layer loop."""
    B, Lq, D = query.shape
    Lv = v.shape[1]
    Dh = D // num_heads
    LP = num_levels * num_points

    # sampling_offsets + attention_weights share the query input -> one fused matmul
    so_w, so_b = p["sampling_offsets_w"], p["sampling_offsets_b"]
    aw_w, aw_b = p["attention_weights_w"], p["attention_weights_b"]
    n_off = so_w.shape[1]
    fused = pallas_linear(query, jnp.concatenate([so_w, aw_w], axis=1),
                          jnp.concatenate([so_b, aw_b], axis=0))
    offs = fused[..., :n_off].reshape(B, Lq, num_heads, num_levels, num_points, 2)
    attn = fused[..., n_off:].reshape(B, Lq, num_heads, LP)
    attn = jax.nn.softmax(attn, axis=-1)                     # softmax over L*P (tiny)

    # reference_points: (B, Lq, 1, 4) -> (cx, cy, w, h)
    centers = reference_points[:, :, None, :, None, :2]
    wh = reference_points[:, :, None, :, None, 2:]
    sampling_locations = centers + offs / num_points * wh * 0.5
    sampling_grids = 2.0 * sampling_locations - 1.0           # (B, Lq, H, L, P, 2)

    # channel-last per-head value maps: one transpose per layer (not per level)
    v_hl = v.transpose(0, 2, 1, 3).reshape(B * num_heads, Lv, Dh)

    sampled_levels = []
    start = 0
    for lvl, (h, w) in enumerate(spatial_shapes):
        v_l = v_hl[:, start:start + h * w].reshape(B * num_heads, h, w, Dh)   # NHWC
        start += h * w
        g_l = sampling_grids[:, :, :, lvl]                                    # (B, Lq, H, P, 2)
        g_l = g_l.transpose(0, 2, 1, 3, 4).reshape(B * num_heads, Lq, num_points, 2)
        sampled_levels.append(grid_sample_bilinear_nhwc(v_l, g_l))            # (B*H, Lq, P, Dh)
    # stack levels -> (B*H, Lq, L, P, Dh); reshape below is a pure view (no HBM transpose)
    sampled = jnp.stack(sampled_levels, axis=2).reshape(B, num_heads, Lq, LP, Dh)
    attn_hl = attn.transpose(0, 2, 1, 3)                                      # (B, H, Lq, LP)

    return pallas_deform_epilogue(sampled, attn_hl, tgt, p["output_proj_w"],
                                  p["output_proj_b"], norm_g, norm_b, num_heads)


def decoder_layer_forward(p, tgt, ref_points_input, v, spatial_shapes,
                          query_pos, num_heads, num_levels, num_points):
    # fused: QKV proj + MHA + single out-proj + residual + norm1 (one kernel)
    tgt = pallas_self_attention_block(tgt, query_pos, p, num_heads)
    # deformable cross-attention; epilogue kernel fuses weighted-sum + output_proj
    # + residual + norm2 (value_proj hoisted to the decoder level)
    tgt = ms_deformable_attention(p["cross"], tgt, tgt + query_pos, ref_points_input,
                                  v, spatial_shapes, num_heads, num_levels,
                                  num_points, p["norm2_g"], p["norm2_b"])
    # fused FFN: linear -> ReLU -> linear -> residual -> norm3 (one kernel)
    tgt = pallas_ffn_block(tgt, p["ffn1_w"], p["ffn1_b"], p["ffn2_w"], p["ffn2_b"],
                           p["norm3_g"], p["norm3_b"])
    return tgt


def transformer_decoder_forward(params, tgt, ref_points_unact, memory, spatial_shapes,
                                level_start_index, num_layers, eval_idx,
                                num_heads, num_levels, num_points):
    del level_start_index  # levels are split from spatial_shapes, as in the reference
    output = tgt
    ref_points_detach = jax.nn.sigmoid(ref_points_unact)
    B, Lv, D = memory.shape
    Dh = D // num_heads
    n_run = eval_idx + 1   # layers actually executed before the break

    # Hoisted value projection: `memory` is layer-invariant, so project once for
    # all executed layers with concatenated weights (one big mem-bound matmul).
    vp_w = jnp.concatenate(
        [params["layers"][i]["cross"]["value_proj_w"] for i in range(n_run)], axis=1)
    vp_b = jnp.concatenate(
        [params["layers"][i]["cross"]["value_proj_b"] for i in range(n_run)], axis=0)
    v_all = pallas_linear(memory, vp_w, vp_b)                 # (B, Lv, n_run*D)

    dec_out_bboxes = []
    dec_out_logits = []
    for i in range(n_run):
        v_i = v_all[..., i * D:(i + 1) * D].reshape(B, Lv, num_heads, Dh)
        ref_points_input = ref_points_detach[:, :, None, :]   # (B, Lq, 1, 4)
        query_pos = pallas_mlp(ref_points_detach, params["query_pos_head"])
        output = decoder_layer_forward(params["layers"][i], output, ref_points_input,
                                       v_i, spatial_shapes, query_pos,
                                       num_heads, num_levels, num_points)
        if i == eval_idx:
            # score head fused with the bbox head into one kernel / one output slab
            bbox, logits = pallas_bbox_score_head(output, ref_points_detach,
                                                  params["bbox_head"][i],
                                                  params["score_head"][i])
            dec_out_bboxes.append(bbox)
            dec_out_logits.append(logits)
            break
        ref_points_detach = pallas_bbox_head(output, ref_points_detach,
                                             params["bbox_head"][i])
    return jnp.stack(dec_out_bboxes), jnp.stack(dec_out_logits)


# ----------------------------------------------------------------------------
# Deterministic parameter construction (synthetic, not a checkpoint)
# Weight matrices are bf16 (pre-cast once); biases / LayerNorm params stay f32.
# ----------------------------------------------------------------------------
def make_params(key, D, H, FF, n_levels, n_points, num_layers, num_classes):
    keys = iter(jax.random.split(key, 512))

    def lin(i, o, scale=0.1):
        kw, kb = jax.random.split(next(keys))
        w = (jax.random.normal(kw, (i, o), jnp.float32) * scale).astype(jnp.bfloat16)
        b = jax.random.normal(kb, (o,), jnp.float32) * 0.01
        return w, b

    params = {
        "query_pos_head": [lin(4, 2 * D), lin(2 * D, D)],
        "layers": [],
        "bbox_head": [],
        "score_head": [],
    }
    for _ in range(num_layers):
        p = {}
        p["q_w"], p["q_b"] = lin(D, D)
        p["k_w"], p["k_b"] = lin(D, D)
        p["v_w"], p["v_b"] = lin(D, D)
        p["attn_out_w"], p["attn_out_b"] = lin(D, D)
        for n in ("norm1", "norm2", "norm3"):
            p[f"{n}_g"] = jnp.ones((D,), jnp.float32)
            p[f"{n}_b"] = jnp.zeros((D,), jnp.float32)
        cross = {}
        cross["value_proj_w"], cross["value_proj_b"] = lin(D, D)
        cross["sampling_offsets_w"], cross["sampling_offsets_b"] = lin(D, H * n_levels * n_points * 2)
        cross["attention_weights_w"], cross["attention_weights_b"] = lin(D, H * n_levels * n_points)
        cross["output_proj_w"], cross["output_proj_b"] = lin(D, D)
        p["cross"] = cross
        p["ffn1_w"], p["ffn1_b"] = lin(D, FF)
        p["ffn2_w"], p["ffn2_b"] = lin(FF, D)
        params["layers"].append(p)
        params["bbox_head"].append([lin(D, D), lin(D, D), lin(D, 4)])
        params["score_head"].append(lin(D, num_classes))
    return params


if __name__ == "__main__":
    B, Lq, D = 2, 8, 32
    H = 4                    # attention heads
    FF = 64                  # decoder-layer FFN dim
    n_levels, n_points = 2, 2
    num_layers = 2
    num_classes = 10
    eval_idx = -1
    eval_idx = eval_idx if eval_idx >= 0 else num_layers + eval_idx
    spatial_shapes = [(8, 8), (4, 4)]
    level_start_index = [0, 64]
    Lv = sum(h * w for h, w in spatial_shapes)

    key = jax.random.PRNGKey(0)
    k_params, k_tgt, k_ref, k_mem = jax.random.split(key, 4)
    params = make_params(k_params, D, H, FF, n_levels, n_points, num_layers, num_classes)
    tgt = jax.random.normal(k_tgt, (B, Lq, D), jnp.float32)
    ref_points_unact = jax.random.normal(k_ref, (B, Lq, 4), jnp.float32)
    memory = jax.random.normal(k_mem, (B, Lv, D), jnp.float32)

    bboxes, logits = transformer_decoder_forward(
        params, tgt, ref_points_unact, memory, spatial_shapes, level_start_index,
        num_layers, eval_idx, H, n_levels, n_points)
    jax.block_until_ready((bboxes, logits))

    assert bboxes.shape == (1, B, Lq, 4), bboxes.shape
    assert logits.shape == (1, B, Lq, num_classes), logits.shape
    assert bool(jnp.all(jnp.isfinite(bboxes))) and bool(jnp.all(jnp.isfinite(logits)))
    assert bool(jnp.all((bboxes >= 0.0) & (bboxes <= 1.0)))
    print("KERNEL_OK")
</pallas_src>

<mosaic_0001>
module attributes {stable_mosaic.version = 11 : i64} {
  func.func @_linear_kernel(%arg0: i32, %arg1: memref<160x32xf32, #tpu.memory_space<vmem>>, %arg2: memref<32x64xbf16, #tpu.memory_space<vmem>>, %arg3: memref<1x64xf32, #tpu.memory_space<vmem>>, %arg4: memref<160x64xf32, #tpu.memory_space<vmem>>) attributes {dimension_semantics = [#tpu.dimension_semantics<parallel>], iteration_bounds = array<i64: 1>, scalar_prefetch = 0 : i64, scratch_operands = 0 : i64, tpu.core_type = #tpu.core_type<tc>, window_params = [{transform_indices = @transform_0, window_bounds = array<i64: 160, 32>}, {pipeline_mode = #tpu.pipeline_mode<synchronous>, transform_indices = @transform_1, window_bounds = array<i64: 32, 64>}, {pipeline_mode = #tpu.pipeline_mode<synchronous>, transform_indices = @transform_2, window_bounds = array<i64: 1, 64>}, {transform_indices = @transform_3, window_bounds = array<i64: 160, 64>}]} {
    %c0 = arith.constant 0 : index
    %c0_0 = arith.constant 0 : index
    %0 = vector.load %arg1[%c0, %c0_0] : memref<160x32xf32, #tpu.memory_space<vmem>>, vector<160x32xf32>
    %1 = arith.truncf %0 : vector<160x32xf32> to vector<160x32xbf16>
    %c0_1 = arith.constant 0 : index
    %c0_2 = arith.constant 0 : index
    %2 = vector.load %arg2[%c0_1, %c0_2] : memref<32x64xbf16, #tpu.memory_space<vmem>>, vector<32x64xbf16>
    %cst = arith.constant dense<0.000000e+00> : vector<160x64xf32>
    %3 = tpu.matmul %1, %2, %cst {dimension_numbers = #tpu.dot_dimension_numbers<[1], [0], [0], [1], [0, 0, 1, 1], [], []>} : vector<160x32xbf16>, vector<32x64xbf16>, vector<160x64xf32> -> vector<160x64xf32>
    %c0_3 = arith.constant 0 : index
    %c0_4 = arith.constant 0 : index
    %4 = vector.load %arg3[%c0_3, %c0_4] : memref<1x64xf32, #tpu.memory_space<vmem>>, vector<1x64xf32>
    %5 = vector.broadcast %4 : vector<1x64xf32> to vector<160x64xf32>
    %6 = arith.addf %3, %5 : vector<160x64xf32>
    %c0_5 = arith.constant 0 : index
    %c0_6 = arith.constant 0 : index
    %7 = vector.load %arg4[%c0_5, %c0_6] : memref<160x64xf32, #tpu.memory_space<vmem>>, vector<160x64xf32>
    tpu.vector_store %arg4[%c0_5, %c0_6], %6 {strides = array<i32>} : memref<160x64xf32, #tpu.memory_space<vmem>>, vector<160x64xf32>,
    return
  }
  func.func @transform_0(%arg0: i32) -> (i32, i32) {
    %c0_i32 = arith.constant 0 : i32
    %c0_i32_0 = arith.constant 0 : i32
    return %arg0, %c0_i32 : i32, i32
  }
  func.func @transform_1(%arg0: i32) -> (i32, i32) {
    %c0_i32 = arith.constant 0 : i32
    %c0_i32_0 = arith.constant 0 : i32
    %c0_i32_1 = arith.constant 0 : i32
    return %c0_i32, %c0_i32_0 : i32, i32
  }
  func.func @transform_2(%arg0: i32) -> (i32, i32) {
    %c0_i32 = arith.constant 0 : i32
    %c0_i32_0 = arith.constant 0 : i32
    %c0_i32_1 = arith.constant 0 : i32
    return %c0_i32, %c0_i32_0 : i32, i32
  }
  func.func @transform_3(%arg0: i32) -> (i32, i32) {
    %c0_i32 = arith.constant 0 : i32
    %c0_i32_0 = arith.constant 0 : i32
    return %arg0, %c0_i32 : i32, i32
  }
}

</mosaic_0001>

<bundles_post_ra>
// kernel: tpu_custom_call.1
= control target key start
LH: loop header
LB: loop body
LE: loop exit
PB: predicated region body
PF: predicated region fallthrough
CT: control target
= control target key end

     0   :  { %vm68_vm0 = vcmask 261120   ;;  %vm212_vm1 = vcmask 523264   ;;  %s471_s1 = inlined_call_operand.vmem [shape: bf16[32,64], index: 1, kind: input, shape index: {}]   ;;  %s472_s0 = inlined_call_operand.vmem [shape: f32[160,32], index: 0, kind: input, shape index: {}]   ;;  %s473_s2 = inlined_call_operand.vmem [shape: f32[1,64], index: 2, kind: input, shape index: {}]   ;;  %s474_s3 = inlined_call_operand.vmem [shape: f32[160,64], index: 3, kind: output, shape index: {}]  }
   0x1   :  { %v290_v0 = vld [vmem:[%s471_s1 + $0x8] sm:$0xff]   ;;  %v291_v1 = vld [vmem:[%s471_s1] sm:$0xff]   ;;  %v17_v4 = vld [vmem:[%s472_s0 + $0x10] sm:$0xff] }
   0x2   :  { %262 = vmatprep.subr.bf16.mxu0 %v290_v0  ;;  %286 = vmatprep.subr.bf16.mxu1 %v290_v0  ;;  %v15_v2 = vld [vmem:[%s472_s0] sm:$0xff]  ;;  %v16_v3 = vld [vmem:[%s472_s0 + $0x8] sm:$0xff]  ;;  %v18_v6 = vld [vmem:[%s472_s0 + $0x18] sm:$0xff] }
   0x3   :  { %263 = vmatpush3.bf16.msra.mxu0 %v290_v0  ;;  %288 = vmatpush3.bf16.msra.mxu1 %v290_v0  ;;  %v35_v5 = vpack.c.bf16 %v16_v3, %v15_v2  ;;  %v27_v7 = vld [vmem:[%s472_s0 + $0x60] sm:$0xff]  ;;  %v28_v8 = vld [vmem:[%s472_s0 + $0x68] sm:$0xff]  ;;  %v29_v10 = vld [vmem:[%s472_s0 + $0x70] sm:$0xff]  ;;  %v36_v14 = vpack.c.bf16 %v18_v6, %v17_v4 }
   0x4   :  { %264 = vmatprep.subr.bf16.mxu0 %v291_v1  ;;  %287 = vmatprep.subr.bf16.mxu1 %v291_v1  ;;  %v41_v9 = vpack.c.bf16 %v28_v8, %v27_v7  ;;  %v30_v11 = vld [vmem:[%s472_s0 + $0x78] sm:$0xff]  ;;  %v19_v12 = vld [vmem:[%s472_s0 + $0x20] sm:$0xff]  ;;  %v20_v13 = vld [vmem:[%s472_s0 + $0x28] sm:$0xff] }
   0x5   :  { %266 = vmatprep.mubr.msk.bf16.mxu0 %vm68_vm0, %v35_v5  ;;  %v42_v15 = vpack.c.bf16 %v30_v11, %v29_v10  ;;  %v31_v16 = vld [vmem:[%s472_s0 + $0x80] sm:$0xff]  ;;  %v32_v17 = vld [vmem:[%s472_s0 + $0x88] sm:$0xff]  ;;  %v37_v18 = vpack.c.bf16 %v20_v13, %v19_v12  ;;  %v21_v20 = vld [vmem:[%s472_s0 + $0x30] sm:$0xff] }
   0x6   :  { %278 = vmatprep.mubr.msk.bf16.mxu1 %vm68_vm0, %v41_v9  ;;  %v43_v19 = vpack.c.bf16 %v32_v17, %v31_v16  ;;  %v22_v21 = vld [vmem:[%s472_s0 + $0x38] sm:$0xff]  ;;  %v33_v22 = vld [vmem:[%s472_s0 + $0x90] sm:$0xff]  ;;  %v23_v24 = vld [vmem:[%s472_s0 + $0x40] sm:$0xff] }
   0x7   :  { %265 = vmatpush3.bf16.msra.mxu0 %v291_v1  ;;  %289 = vmatpush3.bf16.msra.mxu1 %v291_v1  ;;  %v34_v23 = vld [vmem:[%s472_s0 + $0x98] sm:$0xff]  ;;  %v24_v25 = vld [vmem:[%s472_s0 + $0x48] sm:$0xff]  ;;  %v38_v26 = vpack.c.bf16 %v22_v21, %v21_v20  ;;  %v25_v29 = vld [vmem:[%s472_s0 + $0x50] sm:$0xff] }
   0x8   :  { %v44_v27 = vpack.c.bf16 %v34_v23, %v33_v22  ;;  %v39_v28 = vpack.c.bf16 %v24_v25, %v23_v24  ;;  %v26_v30 = vld [vmem:[%s472_s0 + $0x58] sm:$0xff]  ;;  %v237_v32 = vld [vmem:[%s473_s2] ss:$0 sm:$0xff] }
   0x9   :  { %v40_v31 = vpack.c.bf16 %v26_v30, %v25_v29 }
   0xa   :  { %267 = vmatmul.mubr.msk.bf16.vlgmr.msra.gmra.mxu0 %vm68_vm0, %v36_v14  ;;  %279 = vmatmul.mubr.msk.bf16.vlgmr.msra.gmra.mxu1 %vm68_vm0, %v42_v15 }
   0xb   :  { %270 = vmatprep.mubr.msk.bf16.mxu0 %vm68_vm0, %v37_v18  ;;  %282 = vmatprep.mubr.msk.bf16.mxu1 %vm68_vm0, %v43_v19 }
  0x12   :  { %271 = vmatmul.mubr.msk.bf16.gmra.mxu0 %vm68_vm0, %v38_v26  ;;  %283 = vmatmul.mubr.msk.bf16.gmra.mxu1 %vm68_vm0, %v44_v27 }
  0x13   :  { %274 = vmatprep.mubr.msk.bf16.mxu0 %vm68_vm0, %v39_v28 }
  0x1a   :  { %275 = vmatmul.mubr.msk.bf16.gmra.mxu0 %vm68_vm0, %v40_v31 }
  0xca   :  { %v268_v33 = vpop.f32.mrf.mxu0  ;;  %v280_v34 = vpop.f32.mrf.mxu1 }
  0xcb   :  { %v142_v35 = vadd.f32 %v268_v33, %v237_v32  ;;  %v190_v36 = vadd.f32 %v280_v34, %v237_v32 }
  0xcc   :  { %v133_v37 = vpop.f32.mrf.mxu0  ;;  %v181_v38 = vpop.f32.mrf.mxu1 }
  0xcd   :  { %215 = vst.msk [vmem:[%s474_s3 + $0x10] sm:$0xff] %vm212_vm1, %v142_v35  ;;  %v134_v39 = vadd.f32 %v237_v32, %v133_v37  ;;  %227 = vst.msk [vmem:[%s474_s3 + $0x70] sm:$0xff] %vm212_vm1, %v190_v36  ;;  %v182_v40 = vadd.f32 %v237_v32, %v181_v38 }
  0xce   :  { %v269_v41 = vpop.f32.mrf.mxu0  ;;  %v281_v42 = vpop.f32.mrf.mxu1 }
  0xcf   :  { %213 = vst.msk [vmem:[%s474_s3] sm:$0xff] %vm212_vm1, %v134_v39  ;;  %v145_v43 = vadd.f32 %v269_v41, %v237_v32  ;;  %225 = vst.msk [vmem:[%s474_s3 + $0x60] sm:$0xff] %vm212_vm1, %v182_v40  ;;  %v193_v44 = vadd.f32 %v281_v42, %v237_v32 }
  0xd0   :  { %v136_v45 = vpop.f32.mrf.mxu0  ;;  %v184_v46 = vpop.f32.mrf.mxu1 }
  0xd1   :  { %216 = vst.msk [vmem:[%s474_s3 + $0x18] sm:$0xff] %vm212_vm1, %v145_v43  ;;  %v137_v47 = vadd.f32 %v237_v32, %v136_v45  ;;  %228 = vst.msk [vmem:[%s474_s3 + $0x78] sm:$0xff] %vm212_vm1, %v193_v44  ;;  %v185_v48 = vadd.f32 %v237_v32, %v184_v46 }
  0xd2   :  { %v272_v49 = vpop.f32.mrf.mxu0  ;;  %v284_v50 = vpop.f32.mrf.mxu1 }
  0xd3   :  { %214 = vst.msk [vmem:[%s474_s3 + $0x8] sm:$0xff] %vm212_vm1, %v137_v47  ;;  %v158_v51 = vadd.f32 %v272_v49, %v237_v32  ;;  %226 = vst.msk [vmem:[%s474_s3 + $0x68] sm:$0xff] %vm212_vm1, %v185_v48  ;;  %v206_v52 = vadd.f32 %v284_v50, %v237_v32 }
  0xd4   :  { %v149_v53 = vpop.f32.mrf.mxu0  ;;  %v197_v54 = vpop.f32.mrf.mxu1 }
  0xd5   :  { %219 = vst.msk [vmem:[%s474_s3 + $0x30] sm:$0xff] %vm212_vm1, %v158_v51  ;;  %v150_v55 = vadd.f32 %v237_v32, %v149_v53  ;;  %231 = vst.msk [vmem:[%s474_s3 + $0x90] sm:$0xff] %vm212_vm1, %v206_v52  ;;  %v198_v56 = vadd.f32 %v237_v32, %v197_v54 }
  0xd6   :  { %v273_v57 = vpop.f32.mrf.mxu0  ;;  %v285_v58 = vpop.f32.mrf.mxu1 }
  0xd7   :  { %217 = vst.msk [vmem:[%s474_s3 + $0x20] sm:$0xff] %vm212_vm1, %v150_v55  ;;  %v161_v59 = vadd.f32 %v273_v57, %v237_v32  ;;  %229 = vst.msk [vmem:[%s474_s3 + $0x80] sm:$0xff] %vm212_vm1, %v198_v56  ;;  %v209_v60 = vadd.f32 %v285_v58, %v237_v32 }
  0xd8   :  { %v152_v61 = vpop.f32.mrf.mxu0  ;;  %v200_v62 = vpop.f32.mrf.mxu1 }
  0xd9   :  { %220 = vst.msk [vmem:[%s474_s3 + $0x38] sm:$0xff] %vm212_vm1, %v161_v59  ;;  %v153_v63 = vadd.f32 %v237_v32, %v152_v61  ;;  %232 = vst.msk [vmem:[%s474_s3 + $0x98] sm:$0xff] %vm212_vm1, %v209_v60  ;;  %v201_v0 = vadd.f32 %v237_v32, %v200_v62 }
  0xda   :  { %v276_v1 = vpop.f32.mrf.mxu0 }
  0xdb   :  { %218 = vst.msk [vmem:[%s474_s3 + $0x28] sm:$0xff] %vm212_vm1, %v153_v63  ;;  %v174_v2 = vadd.f32 %v276_v1, %v237_v32  ;;  %230 = vst.msk [vmem:[%s474_s3 + $0x88] sm:$0xff] %vm212_vm1, %v201_v0 }
  0xdc   :  { %v165_v3 = vpop.f32.mrf.mxu0 }
  0xdd   :  { %223 = vst.msk [vmem:[%s474_s3 + $0x50] sm:$0xff] %vm212_vm1, %v174_v2  ;;  %v166_v4 = vadd.f32 %v237_v32, %v165_v3 }
  0xde   :  { %v277_v5 = vpop.f32.mrf.mxu0 }
  0xdf   :  { %221 = vst.msk [vmem:[%s474_s3 + $0x40] sm:$0xff] %vm212_vm1, %v166_v4  ;;  %v177_v6 = vadd.f32 %v277_v5, %v237_v32 }
  0xe0   :  { %v168_v7 = vpop.f32.mrf.mxu0 }
  0xe1   :  { %224 = vst.msk [vmem:[%s474_s3 + $0x58] sm:$0xff] %vm212_vm1, %v177_v6  ;;  %v169_v8 = vadd.f32 %v237_v32, %v168_v7 }
  0xe3   :  { %222 = vst.msk [vmem:[%s474_s3 + $0x48] sm:$0xff] %vm212_vm1, %v169_v8 }

</bundles_post_ra>
